<compile_context>
chip_gen: v5e
topology: v5e:2x2
jax: 0.10.0
libtpu: 0.0.40
codegen_flags: <defaults>
</compile_context>

<pallas_src>
import jax
import jax.numpy as jnp
from jax.experimental import pallas as pl
from jax.experimental.pallas import tpu as pltpu

N_EMBD = 256
HEAD_SIZE = 16
NEG_INF = jnp.float32(-1e30)   # finite sentinel: safer than -inf, exp() still underflows to 0


def _head_kernel(x_ref, wqkv_ref, bias_ref, o_ref):
    # x_ref:    (Bb, T, C)  a block of batch elements
    # wqkv_ref: (C, 3H)     fused, pre-transposed [q | k | v] projection weight
    # bias_ref: (T, T)      additive causal mask (0 on/below diagonal, -1e30 above)
    # o_ref:    (Bb, T, H)
    Bb, T, C = x_ref.shape
    H = o_ref.shape[-1]

    # Fused QKV projection: one MXU matmul with M = Bb*T rows, N = 3H columns.
    x2d = x_ref[...].reshape(Bb * T, C)
    qkv = jnp.dot(x2d, wqkv_ref[...], preferred_element_type=jnp.float32)
    qkv = qkv.reshape(Bb, T, 3 * H)
    q = qkv[:, :, 0 * H:1 * H]
    k = qkv[:, :, 1 * H:2 * H]
    v = qkv[:, :, 2 * H:3 * H]

    scale = jnp.float32(C) ** jnp.float32(-0.5)
    scores = jnp.einsum('bqd,bkd->bqk', q, k,
                        preferred_element_type=jnp.float32) * scale
    scores = scores + bias_ref[...]              # (T,T) bias broadcasts over batch

    # Numerically stable softmax; normalization via EUP approximate reciprocal
    # (frees the VALU divide).
    m = jnp.max(scores, axis=-1, keepdims=True)
    e = jnp.exp(scores - m)
    denom = jnp.sum(e, axis=-1, keepdims=True)
    p = e * pl.reciprocal(denom, approx=True)

    out = jnp.einsum('bqk,bkd->bqd', p, v, preferred_element_type=jnp.float32)
    o_ref[...] = out.astype(o_ref.dtype)


def head_forward(x, w_key, w_query, w_value, *, batch_block=None):
    """x: (B, T, C) f32; weights in PyTorch layout (head_size, n_embd).

    Returns (B, T, head_size) f32 (eval-mode forward of the `head` module).
    """
    B, T, C = x.shape
    H = w_key.shape[0]

    # Fuse + pre-transpose once outside the kernel: (C, 3H), columns = [q|k|v].
    w_qkv = jnp.concatenate([w_query, w_key, w_value], axis=0).T.astype(jnp.float32)

    # Additive causal mask built once (not rebuilt each grid step).
    row = jnp.arange(T, dtype=jnp.int32)[:, None]
    col = jnp.arange(T, dtype=jnp.int32)[None, :]
    bias = jnp.where(col <= row, jnp.float32(0.0), NEG_INF)          # (T, T)

    # Batch blocking: largest block that still leaves >=2 parallel grid steps
    # (so v7x's dual TensorCores are both used). Neutral on v5e/v6e.
    if batch_block is None:
        batch_block = B // 2 if (B >= 2 and B % 2 == 0) else 1
    assert B % batch_block == 0
    grid = (B // batch_block,)

    return pl.pallas_call(
        _head_kernel,
        out_shape=jax.ShapeDtypeStruct((B, T, H), jnp.float32),
        grid_spec=pltpu.PrefetchScalarGridSpec(
            num_scalar_prefetch=0,
            grid=grid,
            in_specs=[
                pl.BlockSpec((batch_block, T, C), lambda g: (g, 0, 0)),
                pl.BlockSpec((C, 3 * H), lambda g: (0, 0)),
                pl.BlockSpec((T, T), lambda g: (0, 0)),
            ],
            out_specs=pl.BlockSpec((batch_block, T, H), lambda g: (g, 0, 0)),
        ),
        compiler_params=pltpu.CompilerParams(
            dimension_semantics=("parallel",),
        ),
    )(x, w_qkv, bias)


def head_reference(x, w_key, w_query, w_value):
    """Pure-JAX reference mirroring the PyTorch forward (eval mode)."""
    B, T, C = x.shape
    k = x @ w_key.T
    q = x @ w_query.T
    v = x @ w_value.T
    scores = (q @ jnp.swapaxes(k, -2, -1)) * (C ** -0.5)
    mask = jnp.tril(jnp.ones((T, T), dtype=bool))
    scores = jnp.where(mask, scores, -jnp.inf)
    p = jax.nn.softmax(scores, axis=-1)
    return p @ v


if __name__ == "__main__":
    key = jax.random.PRNGKey(0)
    B, T, C, H = 2, 8, N_EMBD, HEAD_SIZE

    k_x, k_wk, k_wq, k_wv = jax.random.split(key, 4)
    x = jax.random.normal(k_x, (B, T, C), dtype=jnp.float32)
    # Deterministic "nn.Linear(bias=False)"-shaped weights: (head_size, n_embd)
    bound = 1.0 / (C ** 0.5)
    w_key_p = jax.random.uniform(k_wk, (H, C), jnp.float32, -bound, bound)
    w_query_p = jax.random.uniform(k_wq, (H, C), jnp.float32, -bound, bound)
    w_value_p = jax.random.uniform(k_wv, (H, C), jnp.float32, -bound, bound)

    out = head_forward(x, w_key_p, w_query_p, w_value_p)
    out = jax.block_until_ready(out)

    ref = head_reference(x, w_key_p, w_query_p, w_value_p)
    assert out.shape == (B, T, H)
    # Tolerance relaxed slightly vs. exact f32 because the softmax denominator
    # uses the EUP approximate reciprocal.
    assert jnp.allclose(out, ref, atol=1e-2, rtol=1e-2), \
        float(jnp.max(jnp.abs(out - ref)))

    print("KERNEL_OK")
</pallas_src>

<mosaic_0001>
module attributes {stable_mosaic.version = 11 : i64} {
  func.func @_head_kernel(%arg0: i32, %arg1: memref<1x8x256xf32, #tpu.memory_space<vmem>>, %arg2: memref<256x48xf32, #tpu.memory_space<vmem>>, %arg3: memref<8x8xf32, #tpu.memory_space<vmem>>, %arg4: memref<1x8x16xf32, #tpu.memory_space<vmem>>) attributes {dimension_semantics = [#tpu.dimension_semantics<parallel>], iteration_bounds = array<i64: 2>, scalar_prefetch = 0 : i64, scratch_operands = 0 : i64, tpu.core_type = #tpu.core_type<tc>, window_params = [{transform_indices = @transform_0, window_bounds = array<i64: 1, 8, 256>}, {pipeline_mode = #tpu.pipeline_mode<synchronous>, transform_indices = @transform_1, window_bounds = array<i64: 256, 48>}, {pipeline_mode = #tpu.pipeline_mode<synchronous>, transform_indices = @transform_2, window_bounds = array<i64: 8, 8>}, {transform_indices = @transform_3, window_bounds = array<i64: 1, 8, 16>}]} {
    %c0 = arith.constant 0 : index
    %c0_0 = arith.constant 0 : index
    %c0_1 = arith.constant 0 : index
    %0 = vector.load %arg1[%c0, %c0_0, %c0_1] : memref<1x8x256xf32, #tpu.memory_space<vmem>>, vector<1x8x256xf32>
    %1 = vector.shape_cast %0 : vector<1x8x256xf32> to vector<8x256xf32>
    %c0_2 = arith.constant 0 : index
    %c0_3 = arith.constant 0 : index
    %2 = vector.load %arg2[%c0_2, %c0_3] : memref<256x48xf32, #tpu.memory_space<vmem>>, vector<256x48xf32>
    %cst = arith.constant dense<0.000000e+00> : vector<8x48xf32>
    %3 = tpu.matmul %1, %2, %cst {dimension_numbers = #tpu.dot_dimension_numbers<[1], [0], [0], [1], [0, 0, 1, 1], [], []>} : vector<8x256xf32>, vector<256x48xf32>, vector<8x48xf32> -> vector<8x48xf32>
    %4 = vector.shape_cast %3 : vector<8x48xf32> to vector<1x8x48xf32>
    %5 = vector.extract_strided_slice %4 {offsets = [0, 0, 0], sizes = [1, 8, 16], strides = [1, 1, 1]} : vector<1x8x48xf32> to vector<1x8x16xf32>
    %6 = vector.extract_strided_slice %4 {offsets = [0, 0, 16], sizes = [1, 8, 16], strides = [1, 1, 1]} : vector<1x8x48xf32> to vector<1x8x16xf32>
    %7 = vector.extract_strided_slice %4 {offsets = [0, 0, 32], sizes = [1, 8, 16], strides = [1, 1, 1]} : vector<1x8x48xf32> to vector<1x8x16xf32>
    %cst_4 = arith.constant 2.560000e+02 : f32
    %cst_5 = arith.constant -5.000000e-01 : f32
    %8 = math.powf %cst_4, %cst_5 : f32
    "tpu.trace_start"() <{level = 10 : i32, message = "bqd,bkd->bqk"}> : () -> ()
    %cst_6 = arith.constant dense<0.000000e+00> : vector<1x8x8xf32>
    %9 = tpu.matmul %5, %6, %cst_6 {dimension_numbers = #tpu.dot_dimension_numbers<[2], [2], [1], [1], [0, 0, 0, 1, 1, 1], [0], [0]>} : vector<1x8x16xf32>, vector<1x8x16xf32>, vector<1x8x8xf32> -> vector<1x8x8xf32>
    "tpu.trace_stop"() : () -> ()
    %10 = vector.broadcast %8 : f32 to vector<1x8x8xf32>
    %11 = arith.mulf %9, %10 : vector<1x8x8xf32>
    %c0_7 = arith.constant 0 : index
    %c0_8 = arith.constant 0 : index
    %12 = vector.load %arg3[%c0_7, %c0_8] : memref<8x8xf32, #tpu.memory_space<vmem>>, vector<8x8xf32>
    %13 = vector.shape_cast %12 : vector<8x8xf32> to vector<1x8x8xf32>
    %14 = arith.addf %11, %13 : vector<1x8x8xf32>
    %cst_9 = arith.constant dense<0xFF800000> : vector<1x8xf32>
    %15 = vector.multi_reduction <maximumf>, %14, %cst_9 [2] : vector<1x8x8xf32> to vector<1x8xf32>
    %16 = vector.shape_cast %15 : vector<1x8xf32> to vector<1x8x1xf32>
    %17 = vector.broadcast %16 : vector<1x8x1xf32> to vector<1x8x8xf32>
    %18 = arith.subf %14, %17 : vector<1x8x8xf32>
    %19 = math.exp %18 : vector<1x8x8xf32>
    %cst_10 = arith.constant dense<0.000000e+00> : vector<1x8xf32>
    %20 = vector.multi_reduction <add>, %19, %cst_10 [2] : vector<1x8x8xf32> to vector<1x8xf32>
    %21 = vector.shape_cast %20 : vector<1x8xf32> to vector<1x8x1xf32>
    %22 = tpu.reciprocal %21 {approx = true} : vector<1x8x1xf32> -> vector<1x8x1xf32>
    %23 = vector.broadcast %22 : vector<1x8x1xf32> to vector<1x8x8xf32>
    %24 = arith.mulf %19, %23 : vector<1x8x8xf32>
    "tpu.trace_start"() <{level = 10 : i32, message = "bqk,bkd->bqd"}> : () -> ()
    %cst_11 = arith.constant dense<0.000000e+00> : vector<1x8x16xf32>
    %25 = tpu.matmul %24, %7, %cst_11 {dimension_numbers = #tpu.dot_dimension_numbers<[2], [1], [1], [2], [0, 0, 0, 1, 1, 2], [0], [0]>} : vector<1x8x8xf32>, vector<1x8x16xf32>, vector<1x8x16xf32> -> vector<1x8x16xf32>
    "tpu.trace_stop"() : () -> ()
    %c0_12 = arith.constant 0 : index
    %c0_13 = arith.constant 0 : index
    %c0_14 = arith.constant 0 : index
    %26 = vector.load %arg4[%c0_12, %c0_13, %c0_14] : memref<1x8x16xf32, #tpu.memory_space<vmem>>, vector<1x8x16xf32>
    tpu.vector_store %arg4[%c0_12, %c0_13, %c0_14], %25 {strides = array<i32>} : memref<1x8x16xf32, #tpu.memory_space<vmem>>, vector<1x8x16xf32>,
    return
  }
  func.func @transform_0(%arg0: i32) -> (i32, i32, i32) {
    %c0_i32 = arith.constant 0 : i32
    %c0_i32_0 = arith.constant 0 : i32
    %c0_i32_1 = arith.constant 0 : i32
    return %arg0, %c0_i32, %c0_i32_0 : i32, i32, i32
  }
  func.func @transform_1(%arg0: i32) -> (i32, i32) {
    %c0_i32 = arith.constant 0 : i32
    %c0_i32_0 = arith.constant 0 : i32
    %c0_i32_1 = arith.constant 0 : i32
    return %c0_i32, %c0_i32_0 : i32, i32
  }
  func.func @transform_2(%arg0: i32) -> (i32, i32) {
    %c0_i32 = arith.constant 0 : i32
    %c0_i32_0 = arith.constant 0 : i32
    %c0_i32_1 = arith.constant 0 : i32
    return %c0_i32, %c0_i32_0 : i32, i32
  }
  func.func @transform_3(%arg0: i32) -> (i32, i32, i32) {
    %c0_i32 = arith.constant 0 : i32
    %c0_i32_0 = arith.constant 0 : i32
    %c0_i32_1 = arith.constant 0 : i32
    return %arg0, %c0_i32, %c0_i32_0 : i32, i32, i32
  }
}

</mosaic_0001>

<bundles_post_ra>
// kernel: tpu_custom_call.1
= control target key start
LH: loop header
LB: loop body
LE: loop exit
PB: predicated region body
PF: predicated region fallthrough
CT: control target
= control target key end

     0   :  { %8 = vsyncpa [#allocation3], 0  ;;  %s724_s0 = inlined_call_operand.vmem [shape: f32[2,8,256], index: 0, kind: input, shape index: {}]   ;;  %s725_s1 = inlined_call_operand.vmem [shape: f32[256,48], index: 1, kind: input, shape index: {}]   ;;  %s726_s2 = inlined_call_operand.vmem [shape: f32[8,8], index: 2, kind: input, shape index: {}]   ;;  %s727_s3 = inlined_call_operand.hbm [shape: f32[2,8,16], index: 3, kind: output, shape index: {}]  }
   0x1   :  { %10 = vsyncpa [#allocation3 + $0x1], 0  ;;  %s534_s12 = smov 0   ;;  %s536_s13 = smov 0  }
   0x2   :  { %s538_s14 = smov 0   ;;  %s540_s15 = smov 0  }
   0x3 LB: > { %s555_s16 = sadd.s32 4294967295, %s510_s15   ;;  %s388_s17 = sadd.s32 4294967294, %s510_s15   ;;  %s510_s15 = sphi %s540_s15, %s733_s15   ;;  %s506_s14 = sphi %s538_s14, %s732_s14   ;;  %s502_s13 = sphi %s536_s13, %s731_s13   ;;  %s498_s12 = sphi %s534_s12, %s730_s12  }
   0x4   : > { %s559_s18 = sadd.s32 1, %s510_s15   ;;  %s91_s19 = sadd.s32 1, %s506_s14 }
   0x5   : > { %s88_s20 = ssub.s32 %s510_s15, %s559_s18  ;;  %p101_p0 = scmp.ne.s32.totalorder %s506_s14, %s502_s13 }
   0x6   : > { %p89_p1 = scmp.eq.s32.totalorder %s88_s20, 0  ;;  %p102_p2 = scmp.eq.s32.totalorder %s555_s16, 1 }
   0x7   : > { %p107_p3 = scmp.ne.s32.totalorder %s502_s13, %s498_s12  ;;  %p108_p4 = scmp.eq.s32.totalorder %s388_s17, 1 }
   0x8   : > { %s570_s21 = scalar_select %p89_p1, %s506_s14, %s91_s19  }
   0x9   : > { %p572_p5 = por %p102_p2, %p101_p0  ;;  %p576_p6 = por %p108_p4, %p107_p3 }
   0xa   : > { %p391_p7 = scmp.ge.s32.totalorder %s510_s15, 1  ;;  %p140_p8 = scmp.lt.s32.totalorder %s510_s15, 3 }
   0xc   : > { %p141_p9 = pnand %p391_p7, %p140_p8 }
   0xd   : > { %p164_p10 = scmp.lt.s32.totalorder (!%p141_p9), %s555_s16, 1  ;;  %s512_s17 = smov (!%p141_p9), 112  }
   0xe   : > { %144 = sbr.rel (%p141_p9) target bundleno = 839 (0x347), region = 32  ;;  %s513_s24 = smov (!%p141_p9), 96  }
   0xf   : > { %s161_s25 = sand.u32 (!%p141_p9), 1, %s502_s13   ;;  %s399_s27 = sshll.u32 (!%p141_p9), %s555_s16, 3 }
  0x10   : > { %s392_s26 = sshll.u32 (!%p141_p9), %s161_s25, 3  ;;  %s324_s30 = scalar_lea.hbm (!%p141_p9), %s727_s3, %s399_s27 }
  0x11   : > { %s163_s4 = scalar_lea.vmem (!%p141_p9), [#allocation2], %s392_s26  ;;  %s468_s11 = scalar_lea.hbm (!%p141_p9), %s727_s3, 16 }
  0x12   : > { %s326_s6 = sshll.u32 (!%p141_p9), %s163_s4, 4  ;;  %s327_s6 = int_to_ptr.vmem [resolvable:$true] %s326_s6 }
  0x13   : > { %v186_v0 = vld [vmem:[%s725_s1 + $0x78] sm:$0xff]  ;;  %v185_v2 = vld [vmem:[%s725_s1 + $0x70] sm:$0xff]  ;;  %v184_v4 = vld [vmem:[%s725_s1 + $0x68] sm:$0xff]  ;;  %s165_s5 = scalar_select %p164_p10, %s555_s16, 1  ;;  %vm246_vm0 = vcmask 130048   ;;  %vm274_vm1 = vcmask 64512  }
  0x14   : > { %v202_v1 = vld [vmem:[%s725_s1 + $0xf8] sm:$0xff]  ;;  %203 = vmatpush.msra.mxu0 %v186_v0  ;;  %v201_v3 = vld [vmem:[%s725_s1 + $0xf0] sm:$0xff]  ;;  %v200_v5 = vld [vmem:[%s725_s1 + $0xe8] sm:$0xff] }
  0x15   : > { %223 = vmatpush.msra.mxu1 %v202_v1  ;;  %v183_v6 = vld [vmem:[%s725_s1 + $0x60] sm:$0xff]  ;;  %v182_v8 = vld [vmem:[%s725_s1 + $0x58] sm:$0xff]  ;;  %v181_v10 = vld [vmem:[%s725_s1 + $0x50] sm:$0xff]  ;;  %s402_s20 = sshll.u32 %s165_s5, 4  ;;  %s328_s5 = sshll.u32 %s324_s30, 4  ;;  %s329_s5 = int_to_ptr.hbm [resolvable:$true] %s328_s5 }
  0x16   : > { %204 = vmatpush.msra.mxu0 %v185_v2  ;;  %v199_v7 = vld [vmem:[%s725_s1 + $0xe0] sm:$0xff]  ;;  %v198_v9 = vld [vmem:[%s725_s1 + $0xd8] sm:$0xff]  ;;  %v197_v11 = vld [vmem:[%s725_s1 + $0xd0] sm:$0xff]  ;;  %s168_s7 = scalar_lea.vmem %s724_s0, %s402_s20  ;;  %s462_s8 = sshra.s32 %s329_s5, 4  ;;  %s463_s8 = int_to_ptr.hbm [resolvable:$true] %s462_s8 }
  0x17   : > { %224 = vmatpush.msra.mxu1 %v201_v3  ;;  %v180_v12 = vld [vmem:[%s725_s1 + $0x48] sm:$0xff]  ;;  %v179_v14 = vld [vmem:[%s725_s1 + $0x40] sm:$0xff]  ;;  %v178_v16 = vld [vmem:[%s725_s1 + $0x38] sm:$0xff]  ;;  %s464_s9 = scalar_lea.hbm %s463_s8, 8  ;;  %p469_p0 = scmp.lt.s32.totalorder %s463_s8, %s727_s3 }
  0x18   : > { %205 = vmatpush.msra.mxu0 %v184_v4  ;;  %v196_v13 = vld [vmem:[%s725_s1 + $0xc8] sm:$0xff]  ;;  %v195_v15 = vld [vmem:[%s725_s1 + $0xc0] sm:$0xff]  ;;  %v194_v17 = vld [vmem:[%s725_s1 + $0xb8] sm:$0xff]  ;;  %p465_p11 = scmp.ne.s32.totalorder %s463_s8, %s464_s9  ;;  %p470_p1 = scmp.lt.s32.totalorder %s468_s11, %s464_s9 }
  0x19   : > { %225 = vmatpush.msra.mxu1 %v200_v5  ;;  %v177_v18 = vld [vmem:[%s725_s1 + $0x30] sm:$0xff]  ;;  %v176_v20 = vld [vmem:[%s725_s1 + $0x28] sm:$0xff]  ;;  %v175_v22 = vld [vmem:[%s725_s1 + $0x20] sm:$0xff] }
  0x1a   : > { %206 = vmatpush.msra.mxu0 %v183_v6  ;;  %v193_v19 = vld [vmem:[%s725_s1 + $0xb0] sm:$0xff]  ;;  %v192_v21 = vld [vmem:[%s725_s1 + $0xa8] sm:$0xff]  ;;  %v191_v23 = vld [vmem:[%s725_s1 + $0xa0] sm:$0xff]  ;;  %p466_p12 = pnand %p465_p11, %p572_p5  ;;  %p471_p2 = por %p470_p1, %p469_p0 }
  0x1b   : > { %226 = vmatpush.msra.mxu1 %v199_v7  ;;  %v174_v24 = vld [vmem:[%s725_s1 + $0x18] sm:$0xff]  ;;  %v173_v26 = vld [vmem:[%s725_s1 + $0x10] sm:$0xff]  ;;  %v172_v28 = vld [vmem:[%s725_s1 + $0x8] sm:$0xff] }
  0x1c   : > { %207 = vmatpush.msra.mxu0 %v182_v8  ;;  %v190_v25 = vld [vmem:[%s725_s1 + $0x98] sm:$0xff]  ;;  %v189_v27 = vld [vmem:[%s725_s1 + $0x90] sm:$0xff]  ;;  %v188_v29 = vld [vmem:[%s725_s1 + $0x88] sm:$0xff]  ;;  %p467_p13 = pneg %p466_p12 }
  0x1d   : > { %227 = vmatpush.msra.mxu1 %v198_v9  ;;  %v171_v30 = vld [vmem:[%s725_s1] sm:$0xff]  ;;  %v170_v33 = vld [vmem:[%s168_s7 + $0x8] sm:$0xff] }
  0x1e   : > { %208 = vmatpush.msra.mxu0 %v181_v10  ;;  %v187_v31 = vld [vmem:[%s725_s1 + $0x80] sm:$0xff]  ;;  %p472_p3 = pnand %p471_p2, %p467_p13 }
  0x1f   : > { %228 = vmatpush.msra.mxu1 %v197_v11  ;;  %v169_v32 = vld [vmem:[%s168_s7] sm:$0xff]  ;;  %s314_s7 = scalar_lea.sflag [#allocation3], %s161_s25 }
  0x20   : > { %209 = vmatpush.msra.mxu0 %v180_v12  ;;  %v272_v39 = vld [vmem:[%s726_s2] sm:$0xff] }
  0x21   : > { %229 = vmatpush.msra.mxu1 %v196_v13 }
  0x22   : > { %210 = vmatpush.msra.mxu0 %v179_v14 }
  0x23   : > { %230 = vmatpush.msra.mxu1 %v195_v15 }
  0x24   : > { %211 = vmatpush.msra.mxu0 %v178_v16 }
  0x25   : > { %231 = vmatpush.msra.mxu1 %v194_v17 }
  0x26   : > { %212 = vmatpush.msra.mxu0 %v177_v18 }
  0x27   : > { %232 = vmatpush.msra.mxu1 %v193_v19 }
  0x28   : > { %213 = vmatpush.msra.mxu0 %v176_v20 }
  0x29   : > { %233 = vmatpush.msra.mxu1 %v192_v21 }
  0x2a   : > { %214 = vmatpush.msra.mxu0 %v175_v22 }
  0x2b   : > { %234 = vmatpush.msra.mxu1 %v191_v23 }
  0x2c   : > { %215 = vmatpush.msra.mxu0 %v174_v24 }
  0x2d   : > { %235 = vmatpush.msra.mxu1 %v190_v25 }
  0x2e   : > { %216 = vmatpush.msra.mxu0 %v173_v26 }
  0x2f   : > { %236 = vmatpush.msra.mxu1 %v189_v27 }
  0x30   : > { %217 = vmatpush.msra.mxu0 %v172_v28 }
  0x31   : > { %237 = vmatpush.msra.mxu1 %v188_v29 }
  0x32   : > { %218 = vmatpush.msra.mxu0 %v171_v30 }
  0x33   : > { %238 = vmatpush.msra.mxu1 %v187_v31  ;;  %219 = vmatmul.f32.vlgmr.msra.gmra.mxu0 %v169_v32 }
  0x34   : > { %239 = vmatmul.f32.vlgmr.msra.gmra.mxu1 %v170_v33 }
  0xb0   : > { %v220_v34 = vpop.f32.mrf.mxu0 }
  0xb1   : > { %v240_v35 = vpop.f32.mrf.mxu1 }
  0xb2   : > { %v241_v36 = vadd.f32 %v240_v35, %v220_v34 }
  0xb4   : > { %244 = vrot.lane.b32.xlu0 %v241_v36, %s512_s17 }
 0x126   : > { %v245_v37 = vpop.permute.xlu0 %244 }
 0x127   : > { %395 = vmatpush.xpose.msk.msra.mxu2 %vm246_vm0, %v245_v37 }
 0x12a   : > { %396 = vmatmul.msk.f32.vlgmr.msra.gmra.mxu2 %vm246_vm0, %v241_v36 }
 0x1ad   : > { %v268_v38 = vpop.f32.mrf.mxu2 }
 0x1ae   : > { %v271_v40 = vmul.f32 0.0625, %v268_v38 }
 0x1b0   : > { %v273_v41 = vadd.f32 %v272_v39, %v271_v40 }
 0x1b2   : > { %v275_v42 = vsel %vm274_vm1, %v273_v41, -inf }
 0x1b3   : > { %276 = vmax.xlane.f32.xlu0 %v275_v42 }
 0x226   : > { %v277_v43 = vpop.xlane.xlu0 %276 }
 0x227   : > { %v278_v44 = vsub.f32 %v273_v41, %v277_v43 }
 0x229   : > { %v279_v45 = vmul.f32 1.442695, %v278_v44 }
 0x22b   : > { %444 = vpow2.f32 %v279_v45 }
 0x231   : > { %v445_v46 = vpop.eup %444 }
 0x232   : > { %v281_v47 = vsel %vm274_vm1, %v445_v46, 0.0 }
 0x233   : > { %282 = vadd.xlane.f32.xlu1 %v281_v47 }
 0x24c   : > { %286 = vrot.lane.b32.xlu1 %v241_v36, %s513_s24 }
 0x2a6   : > { %v283_v48 = vpop.xlane.xlu1 %282 }
 0x2a7   : > { %446 = vrcp.f32 %v283_v48 }
 0x2ad   : > { %v447_v49 = vpop.eup %446 }
 0x2ae   : > { %v285_v51 = vmul.f32 %v447_v49, %v445_v46 }
 0x2be   : > { %v287_v50 = vpop.permute.xlu1 %286 }
 0x2bf   : > { %307 = vmatpush.msra.mxu3 %v287_v50 }
 0x2c0   : > { %397 = vmatmul.msk.f32.vlgmr.msra.gmra.mxu3 %vm274_vm1, %v285_v51 }
 0x343   : > { %v309_v52 = vpop.f32.mrf.mxu3 }
 0x344   : > { %312 = vst.msk [vmem:[%s163_s4] sm:$0xff] %vm246_vm0, %v309_v52 }
 0x345   : > { %475 = shalt.err (!%p472_p3)
}
 0x346   : > { %403 = dma.vmem_to_hbm [thread:$0]  (%p572_p5), %s327_s6, 128, %s329_s5, %s314_s7  }
 0x347 PF: > { %p409_p4 = scmp.ge.s32.totalorder %s510_s15, 2  ;;  %s340_s20 = sand.u32 1, %s498_s12  }
 0x348   : > { %s341_s24 = scalar_lea.sflag [#allocation3], %s340_s20 }
 0x349   : > { %p406_p7 = pnand %p409_p4, %p576_p6 }
 0x34b   : > { %p407_p8 = pneg %p406_p7 }
 0x34d   : > { %493 = dma.done.wait (%p407_p8), %s341_s24, 128  }
 0x34e   : > { %495 = vsyncadd (%p407_p8), %s341_s24, 4294967168  ;;  %p13_p9 = scmp.ge.s32.totalorder %s559_s18, 4   ;;  %s730_s12 = smov %s502_s13 }
 0x34f   : > { %s731_s13 = smov %s506_s14  ;;  %s732_s14 = smov %s570_s21 }
 0x350   : > { %s733_s15 = smov %s559_s18  ;;  %15 = sbr.rel (!%p13_p9) target bundleno = 3 (0x3), region = 67 }
 0x355   :  { %347 = vsyncpa [#allocation3], 1 }
 0x356   :  { %349 = vsyncpa [#allocation3 + $0x1], 1 }

</bundles_post_ra>
